<compile_context>
chip_gen: v7x
topology: tpu7x:2x2x1
jax: 0.10.0
libtpu: 0.0.40
codegen_flags: <defaults>
</compile_context>

<pallas_src>
import functools

import jax
import jax.numpy as jnp
from jax import lax
from jax.experimental import pallas as pl
from jax.experimental.pallas import tpu as pltpu


# ------------------------------ fused kernel --------------------------------

def _down_kernel(x_ref, w1_ref, w2_ref, a_ref, o_ref, *, hh, wh):
    """Per-batch-element fused Down forward.

    x_ref : (4, Cin_p, N)       the 4 taps of each 2x2 max-pool window, N = hh*wh
    w1_ref: (Cm_p, 9*Cin_p)     conv1 weights, flattened tap-major along K
    w2_ref: (Cout_p, 9*Cm_p)    conv2 weights, flattened tap-major along K
    a_ref : (2,) in SMEM        PReLU alphas
    o_ref : (Cout_p, N)
    """
    n = hh * wh

    # ---- MaxPool2d(2): elementwise max of the 4 window taps (lane-dense) ----
    pooled = jnp.maximum(jnp.maximum(x_ref[0], x_ref[1]),
                         jnp.maximum(x_ref[2], x_ref[3]))            # (Cin_p, N)

    # ---- precompute the 8 combined 3x3-halo border masks ONCE (reused by both convs)
    n_idx = lax.broadcasted_iota(jnp.int32, (1, n), 1)
    if (wh & (wh - 1)) == 0:                       # power-of-two width: cheap bit ops
        j_idx = n_idx & (wh - 1)
    else:
        j_idx = n_idx % wh
    row_ok = {-1: n_idx >= wh, 0: None, 1: n_idx < (n - wh)}
    col_ok = {-1: j_idx >= 1, 0: None, 1: j_idx < (wh - 1)}
    masks = {}
    for dh in (-1, 0, 1):
        for dw in (-1, 0, 1):
            r, c = row_ok[dh], col_ok[dw]
            if r is None:
                masks[(dh, dw)] = c
            elif c is None:
                masks[(dh, dw)] = r
            else:
                masks[(dh, dw)] = jnp.logical_and(r, c)

    def tap_stack(act):
        # Build the (9*C, N) stacked-tap matrix: row k*C + c is channel c shifted by
        # tap k = (dh, dw), with the out-of-image halo zeroed (Conv2d padding=1).
        taps = []
        for k in range(9):
            dh, dw = k // 3 - 1, k % 3 - 1
            s = dh * wh + dw
            t = act if s == 0 else pltpu.roll(act, shift=(-s) % n, axis=1)
            m = masks[(dh, dw)]
            taps.append(t if m is None else jnp.where(m, t, 0.0))
        return jnp.concatenate(taps, axis=0)       # (9*C, N), sublane-tile aligned

    def conv3x3(act, w_ref):
        # single MXU dot per conv: (Cout, 9C) @ (9C, N)
        return jnp.dot(w_ref[...], tap_stack(act),
                       preferred_element_type=jnp.float32,
                       precision=lax.Precision.HIGHEST)

    def inorm_prelu(y, alpha):
        # InstanceNorm2d defaults (affine=False, eps=1e-5, biased var), one-pass stats.
        mean = jnp.mean(y, axis=1, keepdims=True)            # lane reduction
        ex2 = jnp.mean(y * y, axis=1, keepdims=True)         # independent lane reduction
        var = jnp.maximum(ex2 - mean * mean, 0.0)
        yn = (y - mean) * lax.rsqrt(var + 1e-5)
        return jnp.where(yn >= 0.0, yn, alpha * yn)          # PReLU (single alpha)

    y = inorm_prelu(conv3x3(pooled, w1_ref), a_ref[0])       # (Cm_p, N)
    y = inorm_prelu(conv3x3(y, w2_ref), a_ref[1])            # (Cout_p, N)
    o_ref[...] = y.astype(o_ref.dtype)


# --------------------------- one-time param prep ------------------------------

def _round_up(v, m):
    return (v + m - 1) // m * m


def prepare_down_params(params):
    """One-time relayout of the Down parameters (hoisted out of the forward path)."""
    w1 = jnp.asarray(params["w1"], jnp.float32)    # (Cm, Cin, 3, 3)
    w2 = jnp.asarray(params["w2"], jnp.float32)    # (Cout, Cm, 3, 3)
    cm, cin = w1.shape[0], w1.shape[1]
    cout = w2.shape[0]
    cin_p, cm_p, cout_p = _round_up(cin, 8), _round_up(cm, 8), _round_up(cout, 8)

    # zero-pad channel dims to sublane multiples (8): tap slabs become tile aligned
    w1p = jnp.zeros((cm_p, cin_p, 3, 3), jnp.float32).at[:cm, :cin].set(w1)
    w2p = jnp.zeros((cout_p, cm_p, 3, 3), jnp.float32).at[:cout, :cm].set(w2)

    # (O, I, 3, 3) -> (O, 3, 3, I) -> (O, 9*I): K index = (kh*3+kw)*I + c, matching the
    # in-kernel tap stack (concat over taps k of (I, N) slabs).
    w1f = jnp.transpose(w1p, (0, 2, 3, 1)).reshape(cm_p, 9 * cin_p)
    w2f = jnp.transpose(w2p, (0, 2, 3, 1)).reshape(cout_p, 9 * cm_p)
    a = jnp.asarray(params["alphas"], jnp.float32).reshape(2)
    return {"w1_flat": w1f, "w2_flat": w2f, "alphas": a}


# -------------------------------- forward ------------------------------------

def down_forward(x, prepped, *, out_channels=None):
    """x: (B, Cin, H, W) float32, H and W even. Returns (B, Cout, H//2, W//2)."""
    w1f, w2f, a = prepped["w1_flat"], prepped["w2_flat"], prepped["alphas"]
    B, cin, H, W = x.shape
    cm_p = w1f.shape[0]
    cin_p = w1f.shape[1] // 9
    cout_p = w2f.shape[0]
    hh, wh = H // 2, W // 2
    n = hh * wh

    # Layout glue on the raw input only: zero-pad channels to the padded count and
    # expose the 2x2 pool window as a size-4 axis, flattening spatial (lane axis N).
    xf = x.astype(jnp.float32)
    if cin_p != cin:
        xf = jnp.pad(xf, ((0, 0), (0, cin_p - cin), (0, 0), (0, 0)))
    xt = xf.reshape(B, cin_p, hh, 2, wh, 2)
    xt = jnp.transpose(xt, (0, 3, 5, 1, 2, 4)).reshape(B, 4, cin_p, n)

    out = pl.pallas_call(
        functools.partial(_down_kernel, hh=hh, wh=wh),
        out_shape=jax.ShapeDtypeStruct((B, cout_p, n), jnp.float32),
        grid=(B,),
        in_specs=[
            pl.BlockSpec((None, 4, cin_p, n), lambda b: (b, 0, 0, 0)),
            pl.BlockSpec((cm_p, 9 * cin_p), lambda b: (0, 0)),
            pl.BlockSpec((cout_p, 9 * cm_p), lambda b: (0, 0)),
            pl.BlockSpec(memory_space=pltpu.MemorySpace.SMEM),   # PReLU alphas
        ],
        out_specs=pl.BlockSpec((None, cout_p, n), lambda b: (b, 0, 0)),
        compiler_params=pltpu.CompilerParams(dimension_semantics=("parallel",)),
    )(xt, w1f, w2f, a)

    out = out.reshape(B, cout_p, hh, wh)
    oc = cout_p if out_channels is None else out_channels
    return out[:, :oc] if oc != cout_p else out


# --------------------------- pure-JAX reference ------------------------------

def _reference(x, w1, w2, alphas):
    """Plain XLA reference of the PyTorch Down forward (numerical sanity check)."""
    p = lax.reduce_window(x, -jnp.inf, lax.max,
                          window_dimensions=(1, 1, 2, 2),
                          window_strides=(1, 1, 2, 2), padding="VALID")

    def conv(a, w):
        return lax.conv_general_dilated(
            a, w, window_strides=(1, 1), padding=((1, 1), (1, 1)),
            dimension_numbers=("NCHW", "OIHW", "NCHW"),
            precision=lax.Precision.HIGHEST)

    def inorm_prelu(y, alpha):
        mean = jnp.mean(y, axis=(2, 3), keepdims=True)
        var = jnp.mean((y - mean) ** 2, axis=(2, 3), keepdims=True)
        y = (y - mean) * lax.rsqrt(var + 1e-5)
        return jnp.where(y >= 0.0, y, alpha * y)

    y = inorm_prelu(conv(p, w1), alphas[0])
    return inorm_prelu(conv(y, w2), alphas[1])


# ------------------------------- parameters ----------------------------------

def init_params(key, in_ch, out_ch):
    k1, k2 = jax.random.split(key)

    def conv_w(k, cin, cout):
        bound = (cin * 9) ** -0.5
        return jax.random.uniform(k, (cout, cin, 3, 3), jnp.float32, -bound, bound)

    return {
        "w1": conv_w(k1, in_ch, out_ch),     # Conv2d(in, out, 3, padding=1, bias=False)
        "w2": conv_w(k2, out_ch, out_ch),    # Conv2d(out, out, 3, padding=1, bias=False)
        "alphas": jnp.array([0.25, 0.25], jnp.float32),   # PReLU() default init
    }


# ---------------------------------- main --------------------------------------

if __name__ == "__main__":
    key = jax.random.PRNGKey(0)
    kx, kp = jax.random.split(key)

    # Down(4, 8) on a 32x32 image: pooled spatial = 16x16 -> lane axis 256 (lane-dense)
    B, Cin, H, W = 2, 4, 32, 32
    Cout = 8
    x = jax.random.normal(kx, (B, Cin, H, W), jnp.float32)
    params = init_params(kp, Cin, Cout)

    prepped = prepare_down_params(params)      # one-time weight relayout (hoisted)
    fwd = jax.jit(down_forward)
    y = fwd(x, prepped)
    jax.block_until_ready(y)

    assert y.shape == (B, Cout, H // 2, W // 2), y.shape
    assert y.dtype == jnp.float32

    # numerical sanity check against the pure-JAX reference of the PyTorch module
    y_ref = jax.jit(_reference)(x, params["w1"], params["w2"], params["alphas"])
    err = float(jnp.max(jnp.abs(y - y_ref)))
    assert err < 2e-3, f"max abs error vs reference: {err}"

    print("KERNEL_OK")
</pallas_src>

<mosaic_0001>
module attributes {stable_mosaic.version = 11 : i64} {
  func.func @_down_kernel(%arg0: i32, %arg1: memref<1x4x8x256xf32, #tpu.memory_space<vmem>>, %arg2: memref<8x72xf32, #tpu.memory_space<vmem>>, %arg3: memref<8x72xf32, #tpu.memory_space<vmem>>, %arg4: memref<2xf32, #tpu.memory_space<smem>>, %arg5: memref<1x8x256xf32, #tpu.memory_space<vmem>>) attributes {dimension_semantics = [#tpu.dimension_semantics<parallel>], iteration_bounds = array<i64: 2>, scalar_prefetch = 0 : i64, scratch_operands = 0 : i64, tpu.core_type = #tpu.core_type<tc>, window_params = [{transform_indices = @transform_0, window_bounds = array<i64: 1, 4, 8, 256>}, {pipeline_mode = #tpu.pipeline_mode<synchronous>, transform_indices = @transform_1, window_bounds = array<i64: 8, 72>}, {pipeline_mode = #tpu.pipeline_mode<synchronous>, transform_indices = @transform_2, window_bounds = array<i64: 8, 72>}, {transform_indices = @transform_3, window_bounds = array<i64: 2>}, {transform_indices = @transform_4, window_bounds = array<i64: 1, 8, 256>}]} {
    %c0 = arith.constant 0 : index
    %c0_0 = arith.constant 0 : index
    %c0_1 = arith.constant 0 : index
    %c0_2 = arith.constant 0 : index
    %0 = vector.load %arg1[%c0, %c0_0, %c0_1, %c0_2] : memref<1x4x8x256xf32, #tpu.memory_space<vmem>>, vector<1x1x8x256xf32>
    %1 = vector.shape_cast %0 : vector<1x1x8x256xf32> to vector<8x256xf32>
    %c0_3 = arith.constant 0 : index
    %c1 = arith.constant 1 : index
    %c0_4 = arith.constant 0 : index
    %c0_5 = arith.constant 0 : index
    %2 = vector.load %arg1[%c0_3, %c1, %c0_4, %c0_5] : memref<1x4x8x256xf32, #tpu.memory_space<vmem>>, vector<1x1x8x256xf32>
    %3 = vector.shape_cast %2 : vector<1x1x8x256xf32> to vector<8x256xf32>
    %4 = arith.maximumf %1, %3 : vector<8x256xf32>
    %c0_6 = arith.constant 0 : index
    %c2 = arith.constant 2 : index
    %c0_7 = arith.constant 0 : index
    %c0_8 = arith.constant 0 : index
    %5 = vector.load %arg1[%c0_6, %c2, %c0_7, %c0_8] : memref<1x4x8x256xf32, #tpu.memory_space<vmem>>, vector<1x1x8x256xf32>
    %6 = vector.shape_cast %5 : vector<1x1x8x256xf32> to vector<8x256xf32>
    %c0_9 = arith.constant 0 : index
    %c3 = arith.constant 3 : index
    %c0_10 = arith.constant 0 : index
    %c0_11 = arith.constant 0 : index
    %7 = vector.load %arg1[%c0_9, %c3, %c0_10, %c0_11] : memref<1x4x8x256xf32, #tpu.memory_space<vmem>>, vector<1x1x8x256xf32>
    %8 = vector.shape_cast %7 : vector<1x1x8x256xf32> to vector<8x256xf32>
    %9 = arith.maximumf %6, %8 : vector<8x256xf32>
    %10 = arith.maximumf %4, %9 : vector<8x256xf32>
    %11 = tpu.iota {dimensions = array<i32: 1>} : vector<1x256xi32>
    %c15_i32 = arith.constant 15 : i32
    %12 = vector.broadcast %c15_i32 : i32 to vector<1x256xi32>
    %13 = arith.andi %11, %12 : vector<1x256xi32>
    %c16_i32 = arith.constant 16 : i32
    %14 = vector.broadcast %c16_i32 : i32 to vector<1x256xi32>
    %15 = arith.cmpi sge, %11, %14 : vector<1x256xi32>
    %c240_i32 = arith.constant 240 : i32
    %16 = vector.broadcast %c240_i32 : i32 to vector<1x256xi32>
    %17 = arith.cmpi slt, %11, %16 : vector<1x256xi32>
    %c1_i32 = arith.constant 1 : i32
    %18 = vector.broadcast %c1_i32 : i32 to vector<1x256xi32>
    %19 = arith.cmpi sge, %13, %18 : vector<1x256xi32>
    %c15_i32_12 = arith.constant 15 : i32
    %20 = vector.broadcast %c15_i32_12 : i32 to vector<1x256xi32>
    %21 = arith.cmpi slt, %13, %20 : vector<1x256xi32>
    %22 = arith.andi %15, %19 : vector<1x256xi1>
    %23 = arith.andi %15, %21 : vector<1x256xi1>
    %24 = arith.andi %17, %19 : vector<1x256xi1>
    %25 = arith.andi %17, %21 : vector<1x256xi1>
    %c0_13 = arith.constant 0 : index
    %c0_14 = arith.constant 0 : index
    %26 = vector.load %arg2[%c0_13, %c0_14] : memref<8x72xf32, #tpu.memory_space<vmem>>, vector<8x72xf32>
    %c17_i32 = arith.constant 17 : i32
    %27 = tpu.dynamic_rotate %10 by %c17_i32 dim 1 : vector<8x256xf32>, i32 -> vector<8x256xf32>
    %cst = arith.constant 0.000000e+00 : f32
    %28 = vector.shape_cast %22 : vector<1x256xi1> to vector<1x256xi1>
    %29 = vector.broadcast %28 : vector<1x256xi1> to vector<8x256xi1>
    %30 = vector.broadcast %cst : f32 to vector<8x256xf32>
    %31 = arith.select %29, %27, %30 : vector<8x256xi1>, vector<8x256xf32>
    %c16_i32_15 = arith.constant 16 : i32
    %32 = tpu.dynamic_rotate %10 by %c16_i32_15 dim 1 : vector<8x256xf32>, i32 -> vector<8x256xf32>
    %cst_16 = arith.constant 0.000000e+00 : f32
    %33 = vector.shape_cast %15 : vector<1x256xi1> to vector<1x256xi1>
    %34 = vector.broadcast %33 : vector<1x256xi1> to vector<8x256xi1>
    %35 = vector.broadcast %cst_16 : f32 to vector<8x256xf32>
    %36 = arith.select %34, %32, %35 : vector<8x256xi1>, vector<8x256xf32>
    %c15_i32_17 = arith.constant 15 : i32
    %37 = tpu.dynamic_rotate %10 by %c15_i32_17 dim 1 : vector<8x256xf32>, i32 -> vector<8x256xf32>
    %cst_18 = arith.constant 0.000000e+00 : f32
    %38 = vector.shape_cast %23 : vector<1x256xi1> to vector<1x256xi1>
    %39 = vector.broadcast %38 : vector<1x256xi1> to vector<8x256xi1>
    %40 = vector.broadcast %cst_18 : f32 to vector<8x256xf32>
    %41 = arith.select %39, %37, %40 : vector<8x256xi1>, vector<8x256xf32>
    %c1_i32_19 = arith.constant 1 : i32
    %42 = tpu.dynamic_rotate %10 by %c1_i32_19 dim 1 : vector<8x256xf32>, i32 -> vector<8x256xf32>
    %cst_20 = arith.constant 0.000000e+00 : f32
    %43 = vector.shape_cast %19 : vector<1x256xi1> to vector<1x256xi1>
    %44 = vector.broadcast %43 : vector<1x256xi1> to vector<8x256xi1>
    %45 = vector.broadcast %cst_20 : f32 to vector<8x256xf32>
    %46 = arith.select %44, %42, %45 : vector<8x256xi1>, vector<8x256xf32>
    %c255_i32 = arith.constant 255 : i32
    %47 = tpu.dynamic_rotate %10 by %c255_i32 dim 1 : vector<8x256xf32>, i32 -> vector<8x256xf32>
    %cst_21 = arith.constant 0.000000e+00 : f32
    %48 = vector.shape_cast %21 : vector<1x256xi1> to vector<1x256xi1>
    %49 = vector.broadcast %48 : vector<1x256xi1> to vector<8x256xi1>
    %50 = vector.broadcast %cst_21 : f32 to vector<8x256xf32>
    %51 = arith.select %49, %47, %50 : vector<8x256xi1>, vector<8x256xf32>
    %c241_i32 = arith.constant 241 : i32
    %52 = tpu.dynamic_rotate %10 by %c241_i32 dim 1 : vector<8x256xf32>, i32 -> vector<8x256xf32>
    %cst_22 = arith.constant 0.000000e+00 : f32
    %53 = vector.shape_cast %24 : vector<1x256xi1> to vector<1x256xi1>
    %54 = vector.broadcast %53 : vector<1x256xi1> to vector<8x256xi1>
    %55 = vector.broadcast %cst_22 : f32 to vector<8x256xf32>
    %56 = arith.select %54, %52, %55 : vector<8x256xi1>, vector<8x256xf32>
    %c240_i32_23 = arith.constant 240 : i32
    %57 = tpu.dynamic_rotate %10 by %c240_i32_23 dim 1 : vector<8x256xf32>, i32 -> vector<8x256xf32>
    %cst_24 = arith.constant 0.000000e+00 : f32
    %58 = vector.shape_cast %17 : vector<1x256xi1> to vector<1x256xi1>
    %59 = vector.broadcast %58 : vector<1x256xi1> to vector<8x256xi1>
    %60 = vector.broadcast %cst_24 : f32 to vector<8x256xf32>
    %61 = arith.select %59, %57, %60 : vector<8x256xi1>, vector<8x256xf32>
    %c239_i32 = arith.constant 239 : i32
    %62 = tpu.dynamic_rotate %10 by %c239_i32 dim 1 : vector<8x256xf32>, i32 -> vector<8x256xf32>
    %cst_25 = arith.constant 0.000000e+00 : f32
    %63 = vector.shape_cast %25 : vector<1x256xi1> to vector<1x256xi1>
    %64 = vector.broadcast %63 : vector<1x256xi1> to vector<8x256xi1>
    %65 = vector.broadcast %cst_25 : f32 to vector<8x256xf32>
    %66 = arith.select %64, %62, %65 : vector<8x256xi1>, vector<8x256xf32>
    %67 = tpu.concatenate %31, %36, %41, %46, %10, %51, %56, %61, %66 in 0 : vector<8x256xf32>, vector<8x256xf32>, vector<8x256xf32>, vector<8x256xf32>, vector<8x256xf32>, vector<8x256xf32>, vector<8x256xf32>, vector<8x256xf32>, vector<8x256xf32> -> vector<72x256xf32>
    %cst_26 = arith.constant dense<0.000000e+00> : vector<8x256xf32>
    %68 = tpu.matmul %26, %67, %cst_26 {dimension_numbers = #tpu.dot_dimension_numbers<[1], [0], [0], [1], [0, 0, 1, 1], [], []>, precision = #tpu.contract_precision<fp32>} : vector<8x72xf32>, vector<72x256xf32>, vector<8x256xf32> -> vector<8x256xf32>
    %c0_27 = arith.constant 0 : index
    %69 = memref.load %arg4[%c0_27] : memref<2xf32, #tpu.memory_space<smem>>
    %cst_28 = arith.constant dense<0.000000e+00> : vector<8xf32>
    %70 = vector.multi_reduction <add>, %68, %cst_28 [1] : vector<8x256xf32> to vector<8xf32>
    %71 = vector.shape_cast %70 : vector<8xf32> to vector<8x1xf32>
    %cst_29 = arith.constant 2.560000e+02 : f32
    %72 = vector.broadcast %cst_29 : f32 to vector<8x1xf32>
    %73 = arith.divf %71, %72 : vector<8x1xf32>
    %74 = arith.mulf %68, %68 : vector<8x256xf32>
    %cst_30 = arith.constant dense<0.000000e+00> : vector<8xf32>
    %75 = vector.multi_reduction <add>, %74, %cst_30 [1] : vector<8x256xf32> to vector<8xf32>
    %76 = vector.shape_cast %75 : vector<8xf32> to vector<8x1xf32>
    %cst_31 = arith.constant 2.560000e+02 : f32
    %77 = vector.broadcast %cst_31 : f32 to vector<8x1xf32>
    %78 = arith.divf %76, %77 : vector<8x1xf32>
    %79 = arith.mulf %73, %73 : vector<8x1xf32>
    %80 = arith.subf %78, %79 : vector<8x1xf32>
    %cst_32 = arith.constant 0.000000e+00 : f32
    %81 = vector.broadcast %cst_32 : f32 to vector<8x1xf32>
    %82 = arith.maximumf %80, %81 : vector<8x1xf32>
    %83 = vector.broadcast %73 : vector<8x1xf32> to vector<8x256xf32>
    %84 = arith.subf %68, %83 : vector<8x256xf32>
    %cst_33 = arith.constant 9.99999974E-6 : f32
    %85 = vector.broadcast %cst_33 : f32 to vector<8x1xf32>
    %86 = arith.addf %82, %85 : vector<8x1xf32>
    %87 = math.rsqrt %86 : vector<8x1xf32>
    %88 = vector.broadcast %87 : vector<8x1xf32> to vector<8x256xf32>
    %89 = arith.mulf %84, %88 : vector<8x256xf32>
    %cst_34 = arith.constant 0.000000e+00 : f32
    %90 = vector.broadcast %cst_34 : f32 to vector<8x256xf32>
    %91 = arith.cmpf oge, %89, %90 : vector<8x256xf32>
    %92 = vector.broadcast %69 : f32 to vector<8x256xf32>
    %93 = arith.mulf %92, %89 : vector<8x256xf32>
    %94 = arith.select %91, %89, %93 : vector<8x256xi1>, vector<8x256xf32>
    %c0_35 = arith.constant 0 : index
    %c0_36 = arith.constant 0 : index
    %95 = vector.load %arg3[%c0_35, %c0_36] : memref<8x72xf32, #tpu.memory_space<vmem>>, vector<8x72xf32>
    %c17_i32_37 = arith.constant 17 : i32
    %96 = tpu.dynamic_rotate %94 by %c17_i32_37 dim 1 : vector<8x256xf32>, i32 -> vector<8x256xf32>
    %cst_38 = arith.constant 0.000000e+00 : f32
    %97 = vector.shape_cast %22 : vector<1x256xi1> to vector<1x256xi1>
    %98 = vector.broadcast %97 : vector<1x256xi1> to vector<8x256xi1>
    %99 = vector.broadcast %cst_38 : f32 to vector<8x256xf32>
    %100 = arith.select %98, %96, %99 : vector<8x256xi1>, vector<8x256xf32>
    %c16_i32_39 = arith.constant 16 : i32
    %101 = tpu.dynamic_rotate %94 by %c16_i32_39 dim 1 : vector<8x256xf32>, i32 -> vector<8x256xf32>
    %cst_40 = arith.constant 0.000000e+00 : f32
    %102 = vector.shape_cast %15 : vector<1x256xi1> to vector<1x256xi1>
    %103 = vector.broadcast %102 : vector<1x256xi1> to vector<8x256xi1>
    %104 = vector.broadcast %cst_40 : f32 to vector<8x256xf32>
    %105 = arith.select %103, %101, %104 : vector<8x256xi1>, vector<8x256xf32>
    %c15_i32_41 = arith.constant 15 : i32
    %106 = tpu.dynamic_rotate %94 by %c15_i32_41 dim 1 : vector<8x256xf32>, i32 -> vector<8x256xf32>
    %cst_42 = arith.constant 0.000000e+00 : f32
    %107 = vector.shape_cast %23 : vector<1x256xi1> to vector<1x256xi1>
    %108 = vector.broadcast %107 : vector<1x256xi1> to vector<8x256xi1>
    %109 = vector.broadcast %cst_42 : f32 to vector<8x256xf32>
    %110 = arith.select %108, %106, %109 : vector<8x256xi1>, vector<8x256xf32>
    %c1_i32_43 = arith.constant 1 : i32
    %111 = tpu.dynamic_rotate %94 by %c1_i32_43 dim 1 : vector<8x256xf32>, i32 -> vector<8x256xf32>
    %cst_44 = arith.constant 0.000000e+00 : f32
    %112 = vector.shape_cast %19 : vector<1x256xi1> to vector<1x256xi1>
    %113 = vector.broadcast %112 : vector<1x256xi1> to vector<8x256xi1>
    %114 = vector.broadcast %cst_44 : f32 to vector<8x256xf32>
    %115 = arith.select %113, %111, %114 : vector<8x256xi1>, vector<8x256xf32>
    %c255_i32_45 = arith.constant 255 : i32
    %116 = tpu.dynamic_rotate %94 by %c255_i32_45 dim 1 : vector<8x256xf32>, i32 -> vector<8x256xf32>
    %cst_46 = arith.constant 0.000000e+00 : f32
    %117 = vector.shape_cast %21 : vector<1x256xi1> to vector<1x256xi1>
    %118 = vector.broadcast %117 : vector<1x256xi1> to vector<8x256xi1>
    %119 = vector.broadcast %cst_46 : f32 to vector<8x256xf32>
    %120 = arith.select %118, %116, %119 : vector<8x256xi1>, vector<8x256xf32>
    %c241_i32_47 = arith.constant 241 : i32
    %121 = tpu.dynamic_rotate %94 by %c241_i32_47 dim 1 : vector<8x256xf32>, i32 -> vector<8x256xf32>
    %cst_48 = arith.constant 0.000000e+00 : f32
    %122 = vector.shape_cast %24 : vector<1x256xi1> to vector<1x256xi1>
    %123 = vector.broadcast %122 : vector<1x256xi1> to vector<8x256xi1>
    %124 = vector.broadcast %cst_48 : f32 to vector<8x256xf32>
    %125 = arith.select %123, %121, %124 : vector<8x256xi1>, vector<8x256xf32>
    %c240_i32_49 = arith.constant 240 : i32
    %126 = tpu.dynamic_rotate %94 by %c240_i32_49 dim 1 : vector<8x256xf32>, i32 -> vector<8x256xf32>
    %cst_50 = arith.constant 0.000000e+00 : f32
    %127 = vector.shape_cast %17 : vector<1x256xi1> to vector<1x256xi1>
    %128 = vector.broadcast %127 : vector<1x256xi1> to vector<8x256xi1>
    %129 = vector.broadcast %cst_50 : f32 to vector<8x256xf32>
    %130 = arith.select %128, %126, %129 : vector<8x256xi1>, vector<8x256xf32>
    %c239_i32_51 = arith.constant 239 : i32
    %131 = tpu.dynamic_rotate %94 by %c239_i32_51 dim 1 : vector<8x256xf32>, i32 -> vector<8x256xf32>
    %cst_52 = arith.constant 0.000000e+00 : f32
    %132 = vector.shape_cast %25 : vector<1x256xi1> to vector<1x256xi1>
    %133 = vector.broadcast %132 : vector<1x256xi1> to vector<8x256xi1>
    %134 = vector.broadcast %cst_52 : f32 to vector<8x256xf32>
    %135 = arith.select %133, %131, %134 : vector<8x256xi1>, vector<8x256xf32>
    %136 = tpu.concatenate %100, %105, %110, %115, %94, %120, %125, %130, %135 in 0 : vector<8x256xf32>, vector<8x256xf32>, vector<8x256xf32>, vector<8x256xf32>, vector<8x256xf32>, vector<8x256xf32>, vector<8x256xf32>, vector<8x256xf32>, vector<8x256xf32> -> vector<72x256xf32>
    %cst_53 = arith.constant dense<0.000000e+00> : vector<8x256xf32>
    %137 = tpu.matmul %95, %136, %cst_53 {dimension_numbers = #tpu.dot_dimension_numbers<[1], [0], [0], [1], [0, 0, 1, 1], [], []>, precision = #tpu.contract_precision<fp32>} : vector<8x72xf32>, vector<72x256xf32>, vector<8x256xf32> -> vector<8x256xf32>
    %c1_54 = arith.constant 1 : index
    %138 = memref.load %arg4[%c1_54] : memref<2xf32, #tpu.memory_space<smem>>
    %cst_55 = arith.constant dense<0.000000e+00> : vector<8xf32>
    %139 = vector.multi_reduction <add>, %137, %cst_55 [1] : vector<8x256xf32> to vector<8xf32>
    %140 = vector.shape_cast %139 : vector<8xf32> to vector<8x1xf32>
    %cst_56 = arith.constant 2.560000e+02 : f32
    %141 = vector.broadcast %cst_56 : f32 to vector<8x1xf32>
    %142 = arith.divf %140, %141 : vector<8x1xf32>
    %143 = arith.mulf %137, %137 : vector<8x256xf32>
    %cst_57 = arith.constant dense<0.000000e+00> : vector<8xf32>
    %144 = vector.multi_reduction <add>, %143, %cst_57 [1] : vector<8x256xf32> to vector<8xf32>
    %145 = vector.shape_cast %144 : vector<8xf32> to vector<8x1xf32>
    %cst_58 = arith.constant 2.560000e+02 : f32
    %146 = vector.broadcast %cst_58 : f32 to vector<8x1xf32>
    %147 = arith.divf %145, %146 : vector<8x1xf32>
    %148 = arith.mulf %142, %142 : vector<8x1xf32>
    %149 = arith.subf %147, %148 : vector<8x1xf32>
    %cst_59 = arith.constant 0.000000e+00 : f32
    %150 = vector.broadcast %cst_59 : f32 to vector<8x1xf32>
    %151 = arith.maximumf %149, %150 : vector<8x1xf32>
    %152 = vector.broadcast %142 : vector<8x1xf32> to vector<8x256xf32>
    %153 = arith.subf %137, %152 : vector<8x256xf32>
    %cst_60 = arith.constant 9.99999974E-6 : f32
    %154 = vector.broadcast %cst_60 : f32 to vector<8x1xf32>
    %155 = arith.addf %151, %154 : vector<8x1xf32>
    %156 = math.rsqrt %155 : vector<8x1xf32>
    %157 = vector.broadcast %156 : vector<8x1xf32> to vector<8x256xf32>
    %158 = arith.mulf %153, %157 : vector<8x256xf32>
    %cst_61 = arith.constant 0.000000e+00 : f32
    %159 = vector.broadcast %cst_61 : f32 to vector<8x256xf32>
    %160 = arith.cmpf oge, %158, %159 : vector<8x256xf32>
    %161 = vector.broadcast %138 : f32 to vector<8x256xf32>
    %162 = arith.mulf %161, %158 : vector<8x256xf32>
    %163 = arith.select %160, %158, %162 : vector<8x256xi1>, vector<8x256xf32>
    %c0_62 = arith.constant 0 : index
    %c0_63 = arith.constant 0 : index
    %c0_64 = arith.constant 0 : index
    %164 = vector.load %arg5[%c0_62, %c0_63, %c0_64] : memref<1x8x256xf32, #tpu.memory_space<vmem>>, vector<1x8x256xf32>
    %165 = vector.shape_cast %164 : vector<1x8x256xf32> to vector<8x256xf32>
    %166 = vector.shape_cast %163 : vector<8x256xf32> to vector<1x8x256xf32>
    tpu.vector_store %arg5[%c0_62, %c0_63, %c0_64], %166 {strides = array<i32>} : memref<1x8x256xf32, #tpu.memory_space<vmem>>, vector<1x8x256xf32>,
    return
  }
  func.func @transform_0(%arg0: i32) -> (i32, i32, i32, i32) {
    %c0_i32 = arith.constant 0 : i32
    %c0_i32_0 = arith.constant 0 : i32
    %c0_i32_1 = arith.constant 0 : i32
    %c0_i32_2 = arith.constant 0 : i32
    return %arg0, %c0_i32, %c0_i32_0, %c0_i32_1 : i32, i32, i32, i32
  }
  func.func @transform_1(%arg0: i32) -> (i32, i32) {
    %c0_i32 = arith.constant 0 : i32
    %c0_i32_0 = arith.constant 0 : i32
    %c0_i32_1 = arith.constant 0 : i32
    return %c0_i32, %c0_i32_0 : i32, i32
  }
  func.func @transform_2(%arg0: i32) -> (i32, i32) {
    %c0_i32 = arith.constant 0 : i32
    %c0_i32_0 = arith.constant 0 : i32
    %c0_i32_1 = arith.constant 0 : i32
    return %c0_i32, %c0_i32_0 : i32, i32
  }
  func.func @transform_3(%arg0: i32) -> i32 {
    %c0_i32 = arith.constant 0 : i32
    %c0_i32_0 = arith.constant 0 : i32
    return %c0_i32 : i32
  }
  func.func @transform_4(%arg0: i32) -> (i32, i32, i32) {
    %c0_i32 = arith.constant 0 : i32
    %c0_i32_0 = arith.constant 0 : i32
    %c0_i32_1 = arith.constant 0 : i32
    return %arg0, %c0_i32, %c0_i32_0 : i32, i32, i32
  }
}

</mosaic_0001>

<bundles_post_ra>
// kernel: down_forward.1
= control target key start
LH: loop header
LB: loop body
LE: loop exit
PB: predicated region body
PF: predicated region fallthrough
CT: control target
= control target key end

     0   :  { %9 = vsyncpa [#allocation3], 0  ;;  %s2225_s15 = smov 0   ;;  %s3024_s0 = inlined_call_operand.vmem [shape: f32[2,4,8,256], index: 0, kind: input, shape index: {}]   ;;  %s3025_s1 = inlined_call_operand.vmem [shape: f32[8,72], index: 1, kind: input, shape index: {}]   ;;  %s3026_s2 = inlined_call_operand.vmem [shape: f32[8,72], index: 2, kind: input, shape index: {}]   ;;  %s3027_s3 = inlined_call_operand.vmem [shape: f32[2], index: 3, kind: input, shape index: {}]   ;;  %s3028_s4 = inlined_call_operand.vmem [shape: f32[2,8,256], index: 4, kind: output, shape index: {}]  }
   0x1 LB: > { %s1897_s16 = sadd.s32 4294967295, %s2188_s15   ;;  %p1899_p0 = scmp.ge.s32.totalorder %s2188_s15, 1  ;;  %s2188_s15 = sphi %s2225_s15, %s15_s15  }
   0x2   : > { %p135_p1 = scmp.lt.s32.totalorder %s2188_s15, 3  ;;  %s154_s19 = sshll.u32 %s3027_s3, 4  ;;  %s155_s19 = int_to_ptr.vmem [resolvable:$true] %s154_s19 }
   0x3   : > { %p2139_p3 = scmp.eq.s32.totalorder %s1897_s16, 0  ;;  %s2163_s21 = scalar_lea.vmem %s155_s19, 16 }
   0x4   : > { %p2236_p2 = pnand %p1899_p0, %p135_p1  ;;  %p2164_p6 = scmp.ne.s32.totalorder %s155_s19, %s2163_s21 }
   0x5   : > { %p2171_p10 = scmp.lt.s32.totalorder %s155_s19, %s155_s19  ;;  %p2172_p11 = scmp.lt.s32.totalorder %s2163_s21, %s2163_s21 }
   0x6   : > { %p2135_p4 = pneg %p2236_p2 }
   0x7   : > { %p2173_p12 = por %p2172_p11, %p2171_p10 }
   0x8   : > { %p2136_p5 = pnand %p2139_p3, %p2135_p4 }
   0xa   : > { %p2165_p7 = pneg %p2136_p5 }
   0xc   : > { %p2166_p8 = pnand %p2165_p7, %p2164_p6 }
   0xe   : > { %p2167_p9 = pneg %p2166_p8 }
  0x10   : > { %p2174_p13 = pnand %p2173_p12, %p2167_p9 }
  0x12   : > { %2177 = shalt.err (!%p2174_p13)
}
  0x13   : > { %s2190_s22 = smov [#allocation2]   ;;  %175 = sbr.rel (%p2236_p2) target bundleno = 1289 (0x509), region = 36 }
  0x14   : > { %2138 = dma.vmem_to_smem (!%p2136_p5), %s155_s19, 16, %s2190_s22, [#allocation3]  }
  0x1a   : > { %2183 = dma.done.wait (%p2139_p3), [#allocation3], 16  }
  0x1b   : > { %2185 = vsyncadd (%p2139_p3), [#allocation3], 4294967280 }
  0x1c   : > { %181 = sfence }
  0x1d   : > { %p202_p0 = scmp.lt.s32.totalorder %s1897_s16, 1  ;;  %s2191_s27 = smov 16   ;;  %v3043_v14 = vmov 0.0   ;;  %v229_v15 = vlaneseq  ;;  %vm355_vm6 = vcmask 588800   ;;  %v250_v31 = vld [vmem:[%s3025_s1] sm:$0xff] }
  0x1e   : > { %s2192_s28 = smov 17   ;;  %s2193_s29 = smov 15   ;;  %441 = vmatprep.mubr.f32.mxu0 %v3043_v14  ;;  %1210 = vmatprep.mubr.f32.mxu1 %v3043_v14  ;;  %v357_v42 = vsel %vm355_vm6, %v250_v31, 0 }
  0x1f   : > { %s3102_s16 = smov (!%p202_p0, %s1897_s16), 1  ;;  %s2194_s30 = smov 1   ;;  %v2291_v16 = vand.u32 127, %v229_v15  ;;  %v2354_v48 = vand.u32 4294901760, %v357_v42 }
  0x20   : > { %s1917_s23 = sshll.u32 %s3102_s16, 6  ;;  %s2195_s5 = smov 127  }
  0x21   : > { %s206_s26 = scalar_lea.vmem %s3024_s0, %s1917_s23  ;;  %s2196_s6 = smov 113   ;;  %v2294_v17 = vadd.s32 128, %v2291_v16  ;;  %v232_v18 = vand.u32 15, %v2291_v16  ;;  %vm234_vm0 = vcmp.ge.s32.totalorder %v2291_v16, 16  ;;  %vm268_vm2 = vcmp.lt.s32.totalorder %v2291_v16, 16 }
  0x22   : > { %v212_v0 = vld [vmem:[%s206_s26] sm:$0xff]  ;;  %v1908_v1 = vld [vmem:[%s206_s26 + $0x10] sm:$0xff]  ;;  %v213_v5 = vld [vmem:[%s206_s26 + $0x8] sm:$0xff]  ;;  %s2198_s7 = smov 112   ;;  %s2199_s8 = smov 111   ;;  %vm255_vm3 = vcmp.lt.s32.totalorder %v2291_v16, 17 }
  0x23   : > { %v1910_v2 = vld [vmem:[%s206_s26 + $0x20] sm:$0xff]  ;;  %v217_v3 = vmax.f32 %v212_v0, %v1908_v1  ;;  %v1912_v4 = vld [vmem:[%s206_s26 + $0x30] sm:$0xff]  ;;  %v1909_v6 = vld [vmem:[%s206_s26 + $0x18] sm:$0xff]  ;;  %v233_v19 = vand.u32 15, %v2294_v17  ;;  %vm2299_vm1 = vcmp.ge.s32.totalorder %v232_v18, 1  ;;  %vm281_vm7 = vcmp.lt.s32.totalorder %v2291_v16, 15 }
  0x24   : > { %v225_v7 = vmax.f32 %v1910_v2, %v1912_v4  ;;  %v218_v8 = vmax.f32 %v213_v5, %v1909_v6  ;;  %v1911_v9 = vld [vmem:[%s206_s26 + $0x28] sm:$0xff]  ;;  %v1913_v10 = vld [vmem:[%s206_s26 + $0x38] sm:$0xff]  ;;  %vm2313_vm5 = vmand %vm234_vm0, %vm2299_vm1  ;;  %vm2337_vm8 = vcmp.lt.s32.totalorder %v232_v18, 15  ;;  %vm3030_vm10 = vcmp.lt.s32.totalorder %v2291_v16, 1  ;;  %s1032_s11 = sld [smem:[#allocation2]]  ;;  %s1914_s14 = sld [smem:[#allocation2 + $0x1]] }
  0x25   : > { %v226_v11 = vmax.f32 %v1911_v9, %v1913_v10  ;;  %vm2305_vm4 = vcmp.ge.s32.totalorder %v233_v19, 1  ;;  %vm2341_vm9 = vcmp.lt.s32.totalorder %v233_v19, 15  ;;  %vm3029_vm11 = vcmp.lt.s32.totalorder %v2291_v16, 127  ;;  %vm2362_vm14 = vmand %vm234_vm0, %vm2337_vm8  ;;  %s1918_s17 = sshll.u32 %s3102_s16, 4 }
  0x26   : > { %v2253_v12 = vmax.f32 %v217_v3, %v225_v7  ;;  %vm3049_vm12 = vcmp.lt.s32.totalorder %v2294_v17, 240  ;;  %vm320_vm13 = vcmp.lt.s32.totalorder %v2291_v16, 113  ;;  %vm3031_vm15 = vcmp.lt.s32.totalorder %v2291_v16, 112  ;;  %s211_s20 = scalar_lea.vmem %s3028_s4, %s1918_s17 }
  0x27   : > { %v2259_v13 = vmax.f32 %v218_v8, %v226_v11  ;;  %v2398_v2 = vsub.f32 %v357_v42, %v2354_v48 }
  0x28   : > { %264 = vrot.lane.b32.xlu1 %v2253_v12, %s2191_s27  ;;  %251 = vrot.lane.b32.xlu0 %v2253_v12, %s2192_s28  ;;  %v377_v47 = vand.u32 4294901760, %v2253_v12 }
  0x29   : > { %v375_v41 = vand.u32 4294901760, %v2259_v13 }
  0x2a   : > { %v2391_v62 = vsub.f32 %v2253_v12, %v377_v47 }
  0x2b   : > { %v2374_v55 = vsub.f32 %v2259_v13, %v375_v41 }
  0x2c   : > { %266 = vrot.lane.b32.xlu1 %v2259_v13, %s2191_s27  ;;  %253 = vrot.lane.b32.xlu0 %v2259_v13, %s2192_s28 }
  0x2d   : > { %v3032_v8 = vand.u32 4294901760, %v2374_v55 }
  0x30   : > { %279 = vrot.lane.b32.xlu1 %v2259_v13, %s2193_s29  ;;  %277 = vrot.lane.b32.xlu0 %v2253_v12, %s2193_s29 }
  0x34   : > { %292 = vrot.lane.b32.xlu1 %v2259_v13, %s2194_s30  ;;  %290 = vrot.lane.b32.xlu0 %v2253_v12, %s2194_s30 }
  0x38   : > { %305 = vrot.lane.b32.xlu1 %v2259_v13, %s2195_s5  ;;  %303 = vrot.lane.b32.xlu0 %v2253_v12, %s2195_s5 }
  0x3c   : > { %318 = vrot.lane.b32.xlu1 %v2259_v13, %s2196_s6  ;;  %316 = vrot.lane.b32.xlu0 %v2253_v12, %s2196_s6 }
  0x40   : > { %331 = vrot.lane.b32.xlu1 %v2259_v13, %s2198_s7  ;;  %329 = vrot.lane.b32.xlu0 %v2253_v12, %s2198_s7 }
  0x44   : > { %344 = vrot.lane.b32.xlu1 %v2259_v13, %s2199_s8  ;;  %342 = vrot.lane.b32.xlu0 %v2253_v12, %s2199_s8 }
  0x9a   : > { %v265_v20 = vpop.permute.xlu1 %264  ;;  %v252_v21 = vpop.permute.xlu0 %251 }
  0x9e   : > { %v267_v25 = vpop.permute.xlu1 %266  ;;  %v254_v26 = vpop.permute.xlu0 %253 }
  0x9f   : > { %v269_v27 = vsel %vm268_vm2, %v265_v20, %v267_v25  ;;  %v270_v28 = vsel %vm268_vm2, %v267_v25, %v265_v20  ;;  %v256_v29 = vsel %vm255_vm3, %v252_v21, %v254_v26  ;;  %v257_v30 = vsel %vm255_vm3, %v254_v26, %v252_v21 }
  0xa0   : > { %v275_v32 = vsel %vm234_vm0, %v270_v28, 0.0  ;;  %v363_v33 = vand.u32 4294901760, %v269_v27  ;;  %v262_v34 = vsel %vm2313_vm5, %v257_v30, 0.0  ;;  %v263_v35 = vsel %vm2305_vm4, %v256_v29, 0.0 }
  0xa1   : > { %v359_v36 = vand.u32 4294901760, %v263_v35  ;;  %v365_v37 = vand.u32 4294901760, %v275_v32  ;;  %v361_v38 = vand.u32 4294901760, %v262_v34 }
  0xa2   : > { %v280_v39 = vpop.permute.xlu1 %279  ;;  %v278_v40 = vpop.permute.xlu0 %277  ;;  %v2393_v63 = vsub.f32 %v269_v27, %v363_v33  ;;  %v3033_v27 = vand.u32 4294901760, %v2398_v2 }
  0xa3   : > { %v282_v45 = vsel %vm281_vm7, %v278_v40, %v280_v39  ;;  %v2347_v46 = vpack.c.bf16 %v363_v33, %v359_v36  ;;  %v2356_v49 = vsub.f32 %v275_v32, %v365_v37  ;;  %v283_v51 = vsel %vm281_vm7, %v280_v39, %v278_v40 }
  0xa4   : > { %v2369_v53 = vpack.c.bf16 %v365_v37, %v361_v38  ;;  %v2376_v56 = vsub.f32 %v262_v34, %v361_v38  ;;  %v289_v57 = vsel %vm2341_vm9, %v282_v45, 0.0  ;;  %v288_v0 = vsel %vm2362_vm14, %v283_v51, 0.0 }
  0xa5   : > { %1920 = vmatprep.subr.bf16.mxu0 %v2347_v46  ;;  %v2400_v3 = vsub.f32 %v263_v35, %v359_v36  ;;  %v367_v4 = vand.u32 4294901760, %v289_v57  ;;  %v3034_v9 = vand.u32 4294901760, %v2356_v49  ;;  %v369_v15 = vand.u32 4294901760, %v288_v0 }
  0xa6   : > { %v293_v52 = vpop.permute.xlu1 %292  ;;  %v291_v54 = vpop.permute.xlu0 %290  ;;  %1922 = vmatpush1.bf16.msra.mxu0 %v2369_v53  ;;  %v3035_v10 = vand.u32 4294901760, %v2376_v56  ;;  %v3039_v21 = vand.u32 4294901760, %v2393_v63  ;;  %v3045_v32 = vand.u32 4294901760, %v2391_v62  ;;  %v2446_v37 = vsub.f32 %v2374_v55, %v3032_v8 }
  0xa7   : > { %v295_v58 = vsel %vm3030_vm10, %v291_v54, %v293_v52  ;;  %v296_v59 = vsel %vm3030_vm10, %v293_v52, %v291_v54  ;;  %v2427_v33 = vsub.f32 %v2356_v49, %v3034_v9  ;;  %v3041_v34 = vand.u32 4294901760, %v2400_v3  ;;  %vm2439_vm10 = vmand %vm3049_vm12, %vm2305_vm4 }
  0xa8   : > { %v301_v60 = vsel %vm2299_vm1, %v296_v59, 0.0  ;;  %v302_v61 = vsel %vm2305_vm4, %v295_v58, 0.0  ;;  %v2433_v35 = vsub.f32 %v2376_v56, %v3035_v10  ;;  %v2459_v45 = vsub.f32 %v289_v57, %v367_v4 }
  0xa9   : > { %v371_v1 = vand.u32 4294901760, %v302_v61  ;;  %v373_v5 = vand.u32 4294901760, %v301_v60  ;;  %v468_v52 = vsub.f32 %v2393_v63, %v3039_v21  ;;  %v2469_v54 = vsub.f32 %v2398_v2, %v3033_v27 }
  0xaa   : > { %v306_v6 = vpop.permute.xlu1 %305  ;;  %v304_v7 = vpop.permute.xlu0 %303  ;;  %v2471_v58 = vsub.f32 %v288_v0, %v369_v15 }
  0xab   : > { %v308_v11 = vsel %vm3029_vm11, %v304_v7, %v306_v6  ;;  %v309_v12 = vsel %vm3029_vm11, %v306_v6, %v304_v7  ;;  %v2413_v20 = vpack.c.bf16 %v371_v1, %v367_v4  ;;  %v2417_v28 = vsub.f32 %v302_v61, %v371_v1 }
  0xac   : > { %v314_v18 = vsel %vm2337_vm8, %v308_v11, 0.0  ;;  %v315_v19 = vsel %vm2341_vm9, %v309_v12, 0.0  ;;  %v2420_v30 = vpack.c.bf16 %v373_v5, %v369_v15  ;;  %vm3048_vm11 = vcmp.lt.s32.totalorder %v2291_v16, 111 }
  0xad   : > { %v379_v25 = vand.u32 4294901760, %v315_v19  ;;  %v381_v26 = vand.u32 4294901760, %v314_v18  ;;  %1924 = vmatprep.subr.bf16.mxu0 %v2413_v20  ;;  %v2461_v51 = vsub.f32 %v301_v60, %v373_v5  ;;  %v3036_v13 = vand.u32 4294901760, %v2417_v28 }
  0xae   : > { %v319_v29 = vpop.permute.xlu1 %318  ;;  %v317_v31 = vpop.permute.xlu0 %316  ;;  %1926 = vmatpush1.bf16.msra.mxu0 %v2420_v30  ;;  %v475_v60 = vand.u32 4294901760, %v2427_v33  ;;  %v463_v4 = vand.u32 4294901760, %v2433_v35  ;;  %v456_v7 = vsub.f32 %v2400_v3, %v3041_v34  ;;  %v3038_v11 = vand.u32 4294901760, %v2459_v45 }
  0xaf   : > { %v321_v38 = vsel %vm320_vm13, %v317_v31, %v319_v29  ;;  %v322_v39 = vsel %vm320_vm13, %v319_v29, %v317_v31  ;;  %v2455_v40 = vpack.c.bf16 %v379_v25, %v375_v41  ;;  %v2457_v42 = vpack.c.bf16 %v381_v26, %v377_v47 }
  0xb0   : > { %v2474_v41 = vsub.f32 %v315_v19, %v379_v25  ;;  %v328_v47 = vsel %vm2439_vm10, %v322_v39, 0.0  ;;  %v327_v61 = vsel %vm2299_vm1, %v321_v38, 0.0  ;;  %v3037_v12 = vand.u32 4294901760, %v2461_v51 }
  0xb1   : > { %1928 = vmatprep.subr.bf16.mxu0 %v2455_v40  ;;  %v383_v15 = vand.u32 4294901760, %v328_v47  ;;  %v2496_v29 = vsub.f32 %v314_v18, %v381_v26  ;;  %v385_v31 = vand.u32 4294901760, %v327_v61  ;;  %v492_v39 = vsub.f32 %v2417_v28, %v3036_v13 }
  0xb2   : > { %v332_v57 = vpop.permute.xlu1 %331  ;;  %v330_v59 = vpop.permute.xlu0 %329  ;;  %1930 = vmatpush1.bf16.msra.mxu0 %v2457_v42  ;;  %v3040_v25 = vand.u32 4294901760, %v2474_v41  ;;  %v457_v27 = vand.u32 4294901760, %v456_v7  ;;  %v469_v9 = vand.u32 4294901760, %v468_v52 }
  0xb3   : > { %v334_v0 = vsel %vm3031_vm15, %v330_v59, %v332_v57  ;;  %v335_v1 = vsel %vm3031_vm15, %v332_v57, %v330_v59  ;;  %vm2502_vm15 = vmand %vm3049_vm12, %vm2341_vm9  ;;  %v2520_v10 = vsub.f32 %v328_v47, %v383_v15  ;;  %v3046_v52 = vand.u32 4294901760, %v2496_v29 }
  0xb4   : > { %v341_v5 = vsel %vm3049_vm12, %v335_v1, 0.0  ;;  %v389_v6 = vand.u32 4294901760, %v334_v0  ;;  %v3042_v1 = vand.u32 4294901760, %v2471_v58 }
  0xb5   : > { %v387_v19 = vand.u32 4294901760, %v341_v5 }
  0xb6   : > { %v345_v33 = vpop.permute.xlu1 %344  ;;  %v343_v38 = vpop.permute.xlu0 %342  ;;  %v2518_v8 = vpack.c.bf16 %v389_v6, %v385_v31  ;;  %v2534_v47 = vsub.f32 %v334_v0, %v389_v6  ;;  %v510_v6 = vsub.f32 %v2391_v62, %v3045_v32 }
  0xb7   : > { %v2509_v57 = vsub.f32 %v341_v5, %v387_v19  ;;  %v347_v18 = vsel %vm3048_vm11, %v343_v38, %v345_v33  ;;  %v348_v26 = vsel %vm3048_vm11, %v345_v33, %v343_v38  ;;  %v2515_v59 = vpack.c.bf16 %v387_v19, %v383_v15 }
  0xb8   : > { %v353_v5 = vsel %vm2337_vm8, %v347_v18, 0.0  ;;  %v354_v13 = vsel %vm2502_vm15, %v348_v26, 0.0  ;;  %v480_v19 = vsub.f32 %v2459_v45, %v3038_v11  ;;  %v498_v33 = vsub.f32 %v2461_v51, %v3037_v12 }
  0xb9   : > { %1932 = vmatprep.subr.bf16.mxu0 %v2515_v59  ;;  %v2536_v7 = vand.u32 4294901760, %v354_v13  ;;  %v539_v15 = vand.u32 4294901760, %v2509_v57  ;;  %v446_v38 = vand.u32 4294901760, %v2469_v54  ;;  %v493_v18 = vand.u32 4294901760, %v492_v39 }
  0xba   : > { %1934 = vmatpush1.bf16.msra.mxu0 %v2518_v8  ;;  %v516_v26 = vsub.f32 %v2474_v41, %v3040_v25  ;;  %v486_v12 = vsub.f32 %v2471_v58, %v3042_v1  ;;  %v2547_v11 = vsub.f32 %v327_v61, %v385_v31  ;;  %v2549_v0 = vand.u32 4294901760, %v353_v5 }
  0xbb   : > { %392 = vmatprep.subr.mxu0 %v2536_v7  ;;  %v527_v54 = vand.u32 4294901760, %v2520_v10  ;;  %v1935_v39 = vpack.c.bf16 %v469_v9, %v457_v27  ;;  %v481_v21 = vand.u32 4294901760, %v480_v19  ;;  %v505_v25 = vand.u32 4294901760, %v2446_v37 }
  0xbc   : > { %v499_v34 = vand.u32 4294901760, %v498_v33  ;;  %v522_v61 = vsub.f32 %v2496_v29, %v3046_v52  ;;  %v3047_v31 = vand.u32 4294901760, %v2534_v47  ;;  %v1937_v1 = vpack.c.bf16 %v475_v60, %v463_v4 }
  0xbd   : > { %v2563_v14 = vsub.f32 %v354_v13, %v2536_v7  ;;  %v1939_v32 = vpack.c.bf16 %v493_v18, %v481_v21  ;;  %v517_v9 = vand.u32 4294901760, %v516_v26  ;;  %v540_v27 = vsub.f32 %v2509_v57, %v539_v15 }
  0xbe   : > { %394 = vmatpush1.msra.mxu0 %v2549_v0  ;;  %v487_v37 = vand.u32 4294901760, %v486_v12  ;;  %v533_v19 = vand.u32 4294901760, %v2547_v11  ;;  %v3072_v33 = vmov 0.0   ;;  %v511_v52 = vand.u32 4294901760, %v510_v6 }
  0xbf   : > { %1936 = vmatprep.subr.bf16.mxu0 %v1935_v39  ;;  %447 = vmatmul.mubr.f32.vlgmr.msra.gmra.mrb[0].mxu0 %v446_v38  ;;  %v528_v13 = vsub.f32 %v2520_v10, %v527_v54  ;;  %v523_v60 = vand.u32 4294901760, %v522_v61  ;;  %v546_v21 = vsub.f32 %v2534_v47, %v3047_v31  ;;  %v2577_v4 = vsub.f32 %v353_v5, %v2549_v0 }
  0xc0   : > { %1938 = vmatpush1.bf16.msra.mxu0 %v1937_v1  ;;  %607 = vmatprep.mubr.f32.mxu0 %v3072_v33  ;;  %v1941_v12 = vpack.c.bf16 %v499_v34, %v487_v37  ;;  %v1943_v38 = vpack.c.bf16 %v517_v9, %v505_v25  ;;  %v541_v18 = vand.u32 4294901760, %v540_v27  ;;  %v551_v1 = vand.u32 4294901760, %v2563_v14 }
  0xc1   : > { %1940 = vmatprep.subr.bf16.mxu0 %v1939_v32  ;;  %v534_v32 = vsub.f32 %v2547_v11, %v533_v19  ;;  %v529_v26 = vand.u32 4294901760, %v528_v13  ;;  %v547_v6 = vand.u32 4294901760, %v546_v21  ;;  %v557_v39 = vand.u32 4294901760, %v2577_v4 }
  0xc2   : > { %v1945_v61 = vpack.c.bf16 %v523_v60, %v511_v52  ;;  %v552_v34 = vsub.f32 %v2563_v14, %v551_v1  ;;  %v1951_v52 = vpack.c.bf16 %v2393_v63, %v2400_v3  ;;  %v1953_v13 = vpack.c.bf16 %v2356_v49, %v2376_v56 }
  0xc3   : > { %v1947_v31 = vpack.c.bf16 %v541_v18, %v529_v26  ;;  %v535_v25 = vand.u32 4294901760, %v534_v32  ;;  %v558_v9 = vsub.f32 %v2577_v4, %v557_v39  ;;  %v1957_v60 = vpack.c.bf16 %v2461_v51, %v2471_v58 }
  0xc4   : > { %1942 = vmatpush1.bf16.msra.mxu0 %v1941_v12  ;;  %v553_v27 = vand.u32 4294901760, %v552_v34  ;;  %v1959_v21 = vpack.c.bf16 %v2474_v41, %v2374_v55  ;;  %v1961_v12 = vpack.c.bf16 %v2496_v29, %v2391_v62  ;;  %v1965_v18 = vpack.c.bf16 %v2534_v47, %v2547_v11 }
  0xc5   : > { %1944 = vmatprep.subr.bf16.mxu0 %v1943_v38  ;;  %v1949_v5 = vpack.c.bf16 %v547_v6, %v535_v25  ;;  %v559_v37 = vand.u32 4294901760, %v558_v9  ;;  %v1963_v38 = vpack.c.bf16 %v2509_v57, %v2520_v10  ;;  %v3073_v32 = vand.u32 4294901760, %v2400_v3 }
  0xc6   : > { %v3074_v26 = vand.u32 4294901760, %v2393_v63  ;;  %v3076_v34 = vand.u32 4294901760, %v2356_v49  ;;  %v3078_v9 = vand.u32 4294901760, %v2459_v45  ;;  %v3080_v63 = vand.u32 4294901760, %v2471_v58 }
  0xc7   : > { %v3082_v49 = vand.u32 4294901760, %v2374_v55  ;;  %v1995_v58 = vpack.c.bf16 %v539_v15, %v527_v54  ;;  %v3086_v55 = vand.u32 4294901760, %v2534_v47 }
  0xc8   : > { %1946 = vmatpush1.bf16.msra.mxu0 %v1945_v61  ;;  %v1983_v6 = vpack.c.bf16 %v3074_v26, %v3073_v32  ;;  %v3075_v61 = vand.u32 4294901760, %v2376_v56  ;;  %v3081_v56 = vand.u32 4294901760, %v2461_v51 }
  0xc9   : > { %1948 = vmatprep.subr.bf16.mxu0 %v1947_v31  ;;  %v1955_v31 = vpack.c.bf16 %v2417_v28, %v2459_v45  ;;  %v3084_v45 = vand.u32 4294901760, %v2391_v62  ;;  %v1997_v51 = vpack.c.bf16 %v3086_v55, %v533_v19 }
  0xca   : > { %v1985_v25 = vpack.c.bf16 %v3076_v34, %v3075_v61  ;;  %v1989_v3 = vpack.c.bf16 %v3081_v56, %v3080_v63 }
  0xcc   : > { %1950 = vmatpush1.bf16.msra.mxu0 %v1949_v5  ;;  %v3077_v5 = vand.u32 4294901760, %v2398_v2 }
  0xcd   : > { %554 = vmatprep.subr.mxu0 %v553_v27  ;;  %v3079_v27 = vand.u32 4294901760, %v2417_v28  ;;  %v3085_v28 = vand.u32 4294901760, %v2496_v29 }
  0xd0   : > { %560 = vmatpush1.msra.mxu0 %v559_v37  ;;  %v1987_v37 = vpack.c.bf16 %v3079_v27, %v3078_v9 }
  0xd1   : > { %1952 = vmatprep.subr.bf16.mxu0 %v1951_v52  ;;  %609 = vmatmul.mubr.f32.vlgmr.msra.gmra.mrb[0].mxu0 %v2354_v48  ;;  %v3083_v52 = vand.u32 4294901760, %v2474_v41 }
  0xd2   : > { %1954 = vmatpush1.bf16.msra.mxu0 %v1953_v13  ;;  %715 = vmatprep.mubr.f32.mxu0 %v3072_v33  ;;  %v1993_v13 = vpack.c.bf16 %v3085_v28, %v3084_v45 }
  0xd3   : > { %1956 = vmatprep.subr.bf16.mxu0 %v1955_v31 }
  0xd6   : > { %1958 = vmatpush1.bf16.msra.mxu0 %v1957_v60 }
  0xd7   : > { %1960 = vmatprep.subr.bf16.mxu0 %v1959_v21 }
  0xda   : > { %1962 = vmatpush1.bf16.msra.mxu0 %v1961_v12  ;;  %v1060_v12 = vld [vmem:[%s3026_s2] sm:$0xff] }
  0xdb   : > { %1964 = vmatprep.subr.bf16.mxu0 %v1963_v38  ;;  %v1126_v34 = vsel %vm355_vm6, %v1060_v12, 0 }
  0xdc   : > { %v2730_v24 = vand.u32 4294901760, %v1126_v34 }
  0xde   : > { %1966 = vmatpush1.bf16.msra.mxu0 %v1965_v18 }
  0xdf   : > { %665 = vmatprep.subr.mxu0 %v2563_v14 }
  0xe2   : > { %668 = vmatpush1.msra.mxu0 %v2577_v4 }
  0xe3   : > { %1968 = vmatprep.subr.bf16.mxu0 %v2347_v46  ;;  %718 = vmatmul.mubr.f32.vlgmr.msra.gmra.mrb[0].mxu0 %v2398_v2  ;;  %v1991_v2 = vpack.c.bf16 %v3083_v52, %v3082_v49 }
  0xe4   : > { %1970 = vmatpush1.bf16.msra.mxu0 %v2369_v53  ;;  %806 = vmatprep.mubr.f32.mxu0 %v3072_v33 }
  0xe5   : > { %1972 = vmatprep.subr.bf16.mxu0 %v2413_v20 }
  0xe8   : > { %1974 = vmatpush1.bf16.msra.mxu0 %v2420_v30 }
  0xe9   : > { %1976 = vmatprep.subr.bf16.mxu0 %v2455_v40 }
  0xec   : > { %1978 = vmatpush1.bf16.msra.mxu0 %v2457_v42 }
  0xed   : > { %1980 = vmatprep.subr.bf16.mxu0 %v2515_v59 }
  0xf0   : > { %1982 = vmatpush1.bf16.msra.mxu0 %v2518_v8 }
  0xf1   : > { %757 = vmatprep.subr.mxu0 %v2536_v7 }
  0xf4   : > { %759 = vmatpush1.msra.mxu0 %v2549_v0 }
  0xf5   : > { %1984 = vmatprep.subr.bf16.mxu0 %v1983_v6  ;;  %810 = vmatmul.mubr.f32.vlgmr.msra.gmra.mrb[0].mxu0 %v3077_v5 }
  0xf6   : > { %1986 = vmatpush1.bf16.msra.mxu0 %v1985_v25  ;;  %934 = vmatprep.mubr.f32.mxu0 %v3072_v33 }
  0xf7   : > { %1988 = vmatprep.subr.bf16.mxu0 %v1987_v37 }
  0xfa   : > { %1990 = vmatpush1.bf16.msra.mxu0 %v1989_v3 }
  0xfb   : > { %1992 = vmatprep.subr.bf16.mxu0 %v1991_v2 }
  0xfe   : > { %1994 = vmatpush1.bf16.msra.mxu0 %v1993_v13  ;;  %v2741_v13 = vsub.f32 %v1126_v34, %v2730_v24 }
  0xff   : > { %1996 = vmatprep.subr.bf16.mxu0 %v1995_v58 }
 0x102   : > { %1998 = vmatpush1.bf16.msra.mxu0 %v1997_v51 }
 0x103   : > { %883 = vmatprep.subr.mxu0 %v551_v1 }
 0x106   : > { %887 = vmatpush1.msra.mxu0 %v557_v39 }
 0x107   : > { %2000 = vmatprep.subr.bf16.mxu0 %v2347_v46  ;;  %936 = vmatmul.mubr.f32.vlgmr.msra.gmra.mrb[0].mxu0 %v2354_v48 }
 0x108   : > { %2002 = vmatpush1.bf16.msra.mxu0 %v2369_v53  ;;  %1024 = vmatprep.mubr.f32.mxu0 %v3072_v33 }
 0x109   : > { %2004 = vmatprep.subr.bf16.mxu0 %v2413_v20 }
 0x10c   : > { %2006 = vmatpush1.bf16.msra.mxu0 %v2420_v30 }
 0x10d   : > { %2008 = vmatprep.subr.bf16.mxu0 %v2455_v40 }
 0x110   : > { %2010 = vmatpush1.bf16.msra.mxu0 %v2457_v42 }
 0x111   : > { %2012 = vmatprep.subr.bf16.mxu0 %v2515_v59 }
 0x114   : > { %2014 = vmatpush1.bf16.msra.mxu0 %v2518_v8 }
 0x115   : > { %975 = vmatprep.subr.mxu0 %v2536_v7  ;;  %v1055_v7 = vstv %s1032_s11 }
 0x118   : > { %977 = vmatpush1.msra.mxu0 %v2549_v0 }
 0x119   : > { %1026 = vmatmul.mubr.f32.vlgmr.msra.gmra.mrb[0].mxu0 %v2354_v48 }
 0x1ec   : > { %v1027_v14 = vpop.f32.mrb[0].mxu0 }
 0x1ed   : > { %v1029_v46 = vpop.f32.mrb[1].mxu0  ;;  %v1038_v53 = vmul.f32 %v1027_v14, %v1027_v14 }
 0x1ee   : > { %v1039_v62 = vmul.f32 %v1029_v46, %v1029_v46  ;;  %v1033_v10 = vadd.f32 %v1029_v46, %v1027_v14 }
 0x1f0   : > { %1034 = vadd.xlane.f32.xlu0 %v1033_v10  ;;  %v1040_v20 = vadd.f32 %v1039_v62, %v1038_v53 }
 0x1f2   : > { %1041 = vadd.xlane.f32.xlu1 %v1040_v20 }
 0x27d   : > { %v1035_v30 = vpop.xlane.xlu0 %1034 }
 0x27e   : > { %v1037_v40 = vmul.f32 0.00390625, %v1035_v30 }
 0x27f   : > { %v1042_v42 = vpop.xlane.xlu1 %1041 }
 0x280   : > { %v1043_v41 = vmul.f32 0.00390625, %v1042_v42  ;;  %v1044_v11 = vmul.f32 %v1037_v40, %v1037_v40  ;;  %v1047_v59 = vsub.f32 %v1027_v14, %v1037_v40  ;;  %v1048_v48 = vsub.f32 %v1029_v46, %v1037_v40 }
 0x282   : > { %v1045_v8 = vsub.f32 %v1043_v41, %v1044_v11  ;;  %v1213_v41 = vand.u32 4294901760, %v2741_v13 }
 0x284   : > { %v1046_v29 = vmax.f32 %v1045_v8, 0.0  ;;  %v2785_v44 = vsub.f32 %v2741_v13, %v1213_v41 }
 0x286   : > { %v1049_v57 = vadd.f32 1e-05, %v1046_v29 }
 0x288   : > { %2159 = vrsqrt.f32 %v1049_v57 }
 0x292   : > { %v2160_v47 = vpop.eup %2159 }
 0x293   : > { %v1051_v15 = vmul.f32 %v2160_v47, %v1047_v59  ;;  %v1052_v0 = vmul.f32 %v2160_v47, %v1048_v48 }
 0x295   : > { %vm1053_vm11 = vcmp.ge.f32.partialorder %v1051_v15, 0.0  ;;  %vm1054_vm12 = vcmp.ge.f32.partialorder %v1052_v0, 0.0  ;;  %v1056_v54 = vmul.f32 %v1055_v7, %v1051_v15  ;;  %v1057_v19 = vmul.f32 %v1055_v7, %v1052_v0 }
 0x297   : > { %v2674_v4 = vsel %vm1053_vm11, %v1051_v15, %v1056_v54  ;;  %v2676_v1 = vsel %vm1054_vm12, %v1052_v0, %v1057_v19 }
 0x298   : > { %1063 = vrot.lane.b32.xlu1 %v2676_v1, %s2192_s28  ;;  %1061 = vrot.lane.b32.xlu0 %v2674_v4, %s2192_s28  ;;  %v1144_v55 = vand.u32 4294901760, %v2676_v1  ;;  %v1146_v10 = vand.u32 4294901760, %v2674_v4 }
 0x29a   : > { %v2763_v50 = vsub.f32 %v2676_v1, %v1144_v55  ;;  %v2776_v0 = vsub.f32 %v2674_v4, %v1146_v10 }
 0x29c   : > { %1071 = vrot.lane.b32.xlu1 %v2676_v1, %s2191_s27  ;;  %1069 = vrot.lane.b32.xlu0 %v2674_v4, %s2191_s27  ;;  %v1272_v12 = vand.u32 4294901760, %v2763_v50 }
 0x2a0   : > { %1079 = vrot.lane.b32.xlu1 %v2676_v1, %s2193_s29  ;;  %1077 = vrot.lane.b32.xlu0 %v2674_v4, %s2193_s29 }
 0x2a4   : > { %1087 = vrot.lane.b32.xlu1 %v2676_v1, %s2194_s30  ;;  %1085 = vrot.lane.b32.xlu0 %v2674_v4, %s2194_s30 }
 0x2a8   : > { %1095 = vrot.lane.b32.xlu1 %v2676_v1, %s2195_s5  ;;  %1093 = vrot.lane.b32.xlu0 %v2674_v4, %s2195_s5 }
 0x2ac   : > { %1103 = vrot.lane.b32.xlu1 %v2676_v1, %s2196_s6  ;;  %1101 = vrot.lane.b32.xlu0 %v2674_v4, %s2196_s6 }
 0x2b0   : > { %1111 = vrot.lane.b32.xlu1 %v2676_v1, %s2198_s7  ;;  %1109 = vrot.lane.b32.xlu0 %v2674_v4, %s2198_s7 }
 0x2b4   : > { %1119 = vrot.lane.b32.xlu1 %v2676_v1, %s2199_s8  ;;  %1117 = vrot.lane.b32.xlu0 %v2674_v4, %s2199_s8 }
 0x30a   : > { %v1064_v39 = vpop.permute.xlu1 %1063  ;;  %v1062_v31 = vpop.permute.xlu0 %1061 }
 0x30b   : > { %v1065_v60 = vsel %vm255_vm3, %v1062_v31, %v1064_v39  ;;  %v1066_v21 = vsel %vm255_vm3, %v1064_v39, %v1062_v31  ;;  %vm3089_vm3 = vcmp.lt.s32.totalorder %v2291_v16, 127 }
 0x30c   : > { %v1068_v38 = vsel %vm2305_vm4, %v1065_v60, 0.0  ;;  %v1067_v26 = vsel %vm2313_vm5, %v1066_v21, 0.0  ;;  %vm3091_vm5 = vcmp.lt.s32.totalorder %v2291_v16, 112 }
 0x30d   : > { %v1128_v25 = vand.u32 4294901760, %v1068_v38  ;;  %v1130_v37 = vand.u32 4294901760, %v1067_v26  ;;  %vm3092_vm6 = vmmov %vm3091_vm5 }
 0x30e   : > { %v1072_v18 = vpop.permute.xlu1 %1071  ;;  %v1070_v32 = vpop.permute.xlu0 %1069 }
 0x30f   : > { %v1073_v6 = vsel %vm268_vm2, %v1070_v32, %v1072_v18  ;;  %v1074_v61 = vsel %vm268_vm2, %v1072_v18, %v1070_v32  ;;  %v2765_v29 = vsub.f32 %v1068_v38, %v1128_v25  ;;  %v2787_v60 = vsub.f32 %v1067_v26, %v1130_v37 }
 0x310   : > { %v1075_v5 = vsel %vm234_vm0, %v1074_v61, 0.0  ;;  %v1132_v9 = vand.u32 4294901760, %v1073_v6  ;;  %vm3087_vm0 = vcmp.lt.s32.totalorder %v2291_v16, 1  ;;  %v1278_v26 = vand.u32 4294901760, %v2776_v0 }
 0x311   : > { %v1134_v27 = vand.u32 4294901760, %v1075_v5  ;;  %vm3088_vm2 = vmmov %vm3087_vm0  ;;  %v1224_v21 = vand.u32 4294901760, %v2765_v29 }
 0x312   : > { %v1080_v63 = vpop.permute.xlu1 %1079  ;;  %v1078_v56 = vpop.permute.xlu0 %1077  ;;  %v2728_v3 = vpack.c.bf16 %v1132_v9, %v1128_v25  ;;  %v2771_v47 = vsub.f32 %v1073_v6, %v1132_v9  ;;  %v1215_v9 = vand.u32 4294901760, %v2785_v44 }
 0x313   : > { %v2733_v49 = vpack.c.bf16 %v1134_v27, %v1130_v37  ;;  %v1081_v52 = vsel %vm281_vm7, %v1078_v56, %v1080_v63  ;;  %v1082_v2 = vsel %vm281_vm7, %v1080_v63, %v1078_v56  ;;  %v2778_v54 = vsub.f32 %v1075_v5, %v1134_v27 }
 0x314   : > { %2016 = vmatprep.subr.bf16.mxu1 %v2728_v3  ;;  %v1084_v51 = vsel %vm2341_vm9, %v1081_v52, 0.0  ;;  %v1083_v53 = vsel %vm2362_vm14, %v1082_v2, 0.0  ;;  %v1236_v38 = vand.u32 4294901760, %v2771_v47  ;;  %v1230_v27 = vand.u32 4294901760, %v2787_v60 }
 0x315   : > { %2018 = vmatpush1.bf16.msra.mxu1 %v2733_v49  ;;  %v1136_v11 = vand.u32 4294901760, %v1084_v51  ;;  %v1138_v57 = vand.u32 4294901760, %v1083_v53  ;;  %v1242_v6 = vand.u32 4294901760, %v2778_v54  ;;  %vm3093_vm7 = vcmp.lt.s32.totalorder %v2294_v17, 240 }
 0x316   : > { %v1088_v45 = vpop.permute.xlu1 %1087  ;;  %v1086_v28 = vpop.permute.xlu0 %1085  ;;  %v1237_v36 = vsub.f32 %v2771_v47, %v1236_v38 }
 0x317   : > { %v1089_v58 = vsel %vm3087_vm0, %v1086_v28, %v1088_v45  ;;  %v1090_v14 = vsel %vm3088_vm2, %v1088_v45, %v1086_v28  ;;  %v2809_v37 = vsub.f32 %v1084_v51, %v1136_v11  ;;  %v1225_v28 = vsub.f32 %v2765_v29, %v1224_v21 }
 0x318   : > { %v1092_v46 = vsel %vm2305_vm4, %v1089_v58, 0.0  ;;  %v1091_v62 = vsel %vm2299_vm1, %v1090_v14, 0.0  ;;  %vm3090_vm4 = vmmov %vm3089_vm3  ;;  %v1243_v14 = vsub.f32 %v2778_v54, %v1242_v6 }
 0x319   : > { %v1140_v20 = vand.u32 4294901760, %v1092_v46  ;;  %v1142_v30 = vand.u32 4294901760, %v1091_v62  ;;  %v1248_v22 = vand.u32 4294901760, %v2809_v37 }
 0x31a   : > { %v1096_v40 = vpop.permute.xlu1 %1095  ;;  %v1094_v42 = vpop.permute.xlu0 %1093 }
 0x31b   : > { %v1097_v8 = vsel %vm3089_vm3, %v1094_v42, %v1096_v40  ;;  %v1098_v23 = vsel %vm3090_vm4, %v1096_v40, %v1094_v42  ;;  %v2773_v15 = vpack.c.bf16 %v1140_v20, %v1136_v11  ;;  %v2780_v39 = vpack.c.bf16 %v1142_v30, %v1138_v57 }
 0x31c   : > { %v1099_v59 = vsel %vm2337_vm8, %v1097_v8, 0.0  ;;  %v1100_v48 = vsel %vm2341_vm9, %v1098_v23, 0.0  ;;  %v2796_v18 = vsub.f32 %v1092_v46, %v1140_v20  ;;  %v2811_v63 = vsub.f32 %v1091_v62, %v1142_v30 }
 0x31d   : > { %v1148_v7 = vand.u32 4294901760, %v1100_v48  ;;  %v1150_v19 = vand.u32 4294901760, %v1099_v59  ;;  %2020 = vmatprep.subr.bf16.mxu1 %v2773_v15  ;;  %v2836_v46 = vsub.f32 %v1083_v53, %v1138_v57 }
 0x31e   : > { %v1104_v1 = vpop.permute.xlu1 %1103  ;;  %v1102_v31 = vpop.permute.xlu0 %1101  ;;  %2022 = vmatpush1.bf16.msra.mxu1 %v2780_v39  ;;  %v1260_v58 = vand.u32 4294901760, %v2796_v18  ;;  %v1266_v40 = vand.u32 4294901760, %v2811_v63 }
 0x31f   : > { %v2792_v4 = vpack.c.bf16 %v1148_v7, %v1144_v55  ;;  %v1106_v32 = vsel %vm320_vm13, %v1104_v1, %v1102_v31  ;;  %v1105_v61 = vsel %vm320_vm13, %v1102_v31, %v1104_v1  ;;  %v2805_v5 = vpack.c.bf16 %v1150_v19, %v1146_v10 }
 0x320   : > { %v2815_v52 = vsub.f32 %v1100_v48, %v1148_v7  ;;  %v1108_v2 = vsel %vm2439_vm10, %v1106_v32, 0.0  ;;  %v1107_v55 = vsel %vm2299_vm1, %v1105_v61, 0.0  ;;  %vm3094_vm1 = vcmp.lt.s32.totalorder %v2291_v16, 111 }
 0x321   : > { %2024 = vmatprep.subr.bf16.mxu1 %v2792_v4  ;;  %v1152_v17 = vand.u32 4294901760, %v1108_v2  ;;  %v2843_v8 = vsub.f32 %v1099_v59, %v1150_v19  ;;  %v1154_v23 = vand.u32 4294901760, %v1107_v55  ;;  %vm3095_vm9 = vmmov %vm3094_vm1  ;;  %v1261_v1 = vsub.f32 %v2796_v18, %v1260_v58 }
 0x322   : > { %v1112_v34 = vpop.permute.xlu1 %1111  ;;  %v1110_v25 = vpop.permute.xlu0 %1109  ;;  %2026 = vmatpush1.bf16.msra.mxu1 %v2805_v5  ;;  %v3050_v11 = vand.u32 4294901760, %v2815_v52  ;;  %v1231_v59 = vsub.f32 %v2787_v60, %v1230_v27  ;;  %v1254_v19 = vand.u32 4294901760, %v2836_v46  ;;  %v1238_v61 = vand.u32 4294901760, %v1237_v36 }
 0x323   : > { %v1113_v56 = vsel %vm3091_vm5, %v1110_v25, %v1112_v34  ;;  %v1114_v45 = vsel %vm3092_vm6, %v1112_v34, %v1110_v25  ;;  %v2864_v32 = vsub.f32 %v1108_v2, %v1152_v17  ;;  %v1249_v34 = vsub.f32 %v2809_v37, %v1248_v22 }
 0x324   : > { %v1116_v51 = vsel %vm3093_vm7, %v1114_v45, 0.0  ;;  %v1158_v10 = vand.u32 4294901760, %v1113_v56  ;;  %v1244_v25 = vand.u32 4294901760, %v1243_v14  ;;  %v1267_v45 = vsub.f32 %v2811_v63, %v1266_v40 }
 0x325   : > { %v1156_v62 = vand.u32 4294901760, %v1116_v51  ;;  %v1226_v2 = vand.u32 4294901760, %v1225_v28  ;;  %v1262_v36 = vand.u32 4294901760, %v1261_v1  ;;  %v1285_v14 = vsub.f32 %v2815_v52, %v3050_v11 }
 0x326   : > { %v1120_v20 = vpop.permute.xlu1 %1119  ;;  %v1118_v30 = vpop.permute.xlu0 %1117  ;;  %v2862_v16 = vpack.c.bf16 %v1158_v10, %v1154_v23  ;;  %v1273_v28 = vsub.f32 %v2763_v50, %v1272_v12  ;;  %v1268_v1 = vand.u32 4294901760, %v1267_v45 }
 0x327   : > { %v1122_v42 = vsel %vm3094_vm1, %v1120_v20, %v1118_v30  ;;  %v1121_v53 = vsel %vm3095_vm9, %v1118_v30, %v1120_v20  ;;  %v2847_v57 = vsub.f32 %v1116_v51, %v1156_v62  ;;  %v2851_v7 = vpack.c.bf16 %v1156_v62, %v1152_v17 }
 0x328   : > { %v1124_v48 = vsel %vm2502_vm15, %v1122_v42, 0.0  ;;  %v1123_v35 = vsel %vm2337_vm8, %v1121_v53, 0.0  ;;  %v3051_v51 = vand.u32 4294901760, %v2843_v8  ;;  %v2876_v62 = vsub.f32 %v1113_v56, %v1158_v10 }
 0x329   : > { %v2860_v31 = vand.u32 4294901760, %v1124_v48  ;;  %2028 = vmatprep.subr.bf16.mxu1 %v2851_v7  ;;  %v3052_v43 = vand.u32 4294901760, %v2847_v57  ;;  %v1232_v20 = vand.u32 4294901760, %v1231_v59  ;;  %v1255_v30 = vsub.f32 %v2836_v46, %v1254_v19 }
 0x32a   : > { %2030 = vmatpush1.bf16.msra.mxu1 %v2862_v16  ;;  %v2887_v17 = vsub.f32 %v1107_v55, %v1154_v23  ;;  %v2889_v56 = vand.u32 4294901760, %v1123_v35  ;;  %v3054_v10 = vand.u32 4294901760, %v2864_v32  ;;  %v2031_v42 = vpack.c.bf16 %v1238_v61, %v1226_v2 }
 0x32b   : > { %1161 = vmatprep.subr.mxu1 %v2860_v31  ;;  %v1250_v53 = vand.u32 4294901760, %v1249_v34  ;;  %v1291_v59 = vsub.f32 %v2843_v8, %v3051_v51  ;;  %v3053_v11 = vand.u32 4294901760, %v2876_v62  ;;  %v2033_v55 = vpack.c.bf16 %v1244_v25, %v1232_v20 }
 0x32c   : > { %v2901_v23 = vsub.f32 %v1124_v48, %v2860_v31  ;;  %v1286_v34 = vand.u32 4294901760, %v1285_v14  ;;  %v1309_v45 = vsub.f32 %v2847_v57, %v3052_v43  ;;  %v1256_v2 = vand.u32 4294901760, %v1255_v30 }
 0x32d   : > { %v2035_v61 = vpack.c.bf16 %v1262_v36, %v1250_v53  ;;  %v1302_v51 = vand.u32 4294901760, %v2887_v17  ;;  %v1279_v25 = vsub.f32 %v2776_v0, %v1278_v26  ;;  %v1274_v48 = vand.u32 4294901760, %v1273_v28 }
 0x32e   : > { %1163 = vmatpush1.msra.mxu1 %v2889_v56  ;;  %v1297_v44 = vsub.f32 %v2864_v32, %v3054_v10  ;;  %v1315_v36 = vsub.f32 %v2876_v62, %v3053_v11  ;;  %v2920_v14 = vsub.f32 %v1123_v35, %v2889_v56  ;;  %v2037_v20 = vpack.c.bf16 %v1268_v1, %v1256_v2 }
 0x32f   : > { %2032 = vmatprep.subr.bf16.mxu1 %v2031_v42  ;;  %1216 = vmatmul.mubr.f32.vlgmr.msra.gmra.mrb[0].mxu1 %v1215_v9  ;;  %v1292_v9 = vand.u32 4294901760, %v1291_v59  ;;  %v2039_v30 = vpack.c.bf16 %v1286_v34, %v1274_v48  ;;  %v1310_v42 = vand.u32 4294901760, %v1309_v45  ;;  %v1320_v53 = vand.u32 4294901760, %v2901_v23 }
 0x330   : > { %2034 = vmatpush1.bf16.msra.mxu1 %v2033_v55  ;;  %1376 = vmatprep.mubr.f32.mxu1 %v3072_v33  ;;  %v1303_v28 = vsub.f32 %v2887_v17, %v1302_v51  ;;  %v1280_v55 = vand.u32 4294901760, %v1279_v25  ;;  %v1298_v59 = vand.u32 4294901760, %v1297_v44  ;;  %v1326_v43 = vand.u32 4294901760, %v2920_v14 }
 0x331   : > { %2036 = vmatprep.subr.bf16.mxu1 %v2035_v61  ;;  %v1316_v61 = vand.u32 4294901760, %v1315_v36  ;;  %v1321_v35 = vsub.f32 %v2901_v23, %v1320_v53  ;;  %v2047_v48 = vpack.c.bf16 %v2771_v47, %v2765_v29  ;;  %v2049_v44 = vpack.c.bf16 %v2778_v54, %v2787_v60 }
 0x332   : > { %v2041_v11 = vpack.c.bf16 %v1292_v9, %v1280_v55  ;;  %v2043_v10 = vpack.c.bf16 %v1310_v42, %v1298_v59  ;;  %v1304_v1 = vand.u32 4294901760, %v1303_v28  ;;  %v1327_v45 = vsub.f32 %v2920_v14, %v1326_v43 }
 0x333   : > { %v1322_v2 = vand.u32 4294901760, %v1321_v35  ;;  %v2055_v9 = vpack.c.bf16 %v2815_v52, %v2763_v50  ;;  %v2057_v36 = vpack.c.bf16 %v2843_v8, %v2776_v0  ;;  %v2079_v42 = vpack.c.bf16 %v1236_v38, %v1224_v21 }
 0x334   : > { %2038 = vmatpush1.bf16.msra.mxu1 %v2037_v20  ;;  %v2045_v34 = vpack.c.bf16 %v1316_v61, %v1304_v1  ;;  %v1328_v25 = vand.u32 4294901760, %v1327_v45  ;;  %v2059_v20 = vpack.c.bf16 %v2847_v57, %v2864_v32  ;;  %v2081_v28 = vpack.c.bf16 %v1242_v6, %v1230_v27 }
 0x335   : > { %2040 = vmatprep.subr.bf16.mxu1 %v2039_v30  ;;  %v2061_v30 = vpack.c.bf16 %v2876_v62, %v2887_v17  ;;  %v2083_v55 = vpack.c.bf16 %v1260_v58, %v1248_v22  ;;  %v2085_v29 = vpack.c.bf16 %v1266_v40, %v1254_v19  ;;  %v3096_v47 = vand.u32 4294901760, %v2815_v52 }
 0x336   : > { %v3098_v60 = vand.u32 4294901760, %v2864_v32  ;;  %v3099_v21 = vand.u32 4294901760, %v2847_v57  ;;  %v3100_v50 = vand.u32 4294901760, %v2876_v62 }
 0x338   : > { %2042 = vmatpush1.bf16.msra.mxu1 %v2041_v11  ;;  %v2051_v11 = vpack.c.bf16 %v2796_v18, %v2809_v37  ;;  %v2091_v38 = vpack.c.bf16 %v3099_v21, %v3098_v60  ;;  %v2093_v18 = vpack.c.bf16 %v3100_v50, %v1302_v51 }
 0x339   : > { %2044 = vmatprep.subr.bf16.mxu1 %v2043_v10  ;;  %v2053_v10 = vpack.c.bf16 %v2811_v63, %v2836_v46  ;;  %v1823_v46 = vstv %s1914_s14 }
 0x33c   : > { %2046 = vmatpush1.bf16.msra.mxu1 %v2045_v34 }
 0x33d   : > { %1323 = vmatprep.subr.mxu1 %v1322_v2 }
 0x340   : > { %1329 = vmatpush1.msra.mxu1 %v1328_v25 }
 0x341   : > { %2048 = vmatprep.subr.bf16.mxu1 %v2047_v48  ;;  %1378 = vmatmul.mubr.f32.vlgmr.msra.gmra.mrb[0].mxu1 %v2730_v24 }
 0x342   : > { %2050 = vmatpush1.bf16.msra.mxu1 %v2049_v44  ;;  %1484 = vmatprep.mubr.f32.mxu1 %v3072_v33 }
 0x343   : > { %2052 = vmatprep.subr.bf16.mxu1 %v2051_v11 }
 0x346   : > { %2054 = vmatpush1.bf16.msra.mxu1 %v2053_v10 }
 0x347   : > { %2056 = vmatprep.subr.bf16.mxu1 %v2055_v9 }
 0x34a   : > { %2058 = vmatpush1.bf16.msra.mxu1 %v2057_v36 }
 0x34b   : > { %2060 = vmatprep.subr.bf16.mxu1 %v2059_v20 }
 0x34e   : > { %2062 = vmatpush1.bf16.msra.mxu1 %v2061_v30 }
 0x34f   : > { %1434 = vmatprep.subr.mxu1 %v2901_v23 }
 0x352   : > { %1437 = vmatpush1.msra.mxu1 %v2920_v14 }
 0x353   : > { %2064 = vmatprep.subr.bf16.mxu1 %v2728_v3  ;;  %1487 = vmatmul.mubr.f32.vlgmr.msra.gmra.mrb[0].mxu1 %v2741_v13  ;;  %v2087_v13 = vpack.c.bf16 %v3096_v47, %v1272_v12 }
 0x354   : > { %2066 = vmatpush1.bf16.msra.mxu1 %v2733_v49  ;;  %1575 = vmatprep.mubr.f32.mxu1 %v3072_v33 }
 0x355   : > { %2068 = vmatprep.subr.bf16.mxu1 %v2773_v15 }
 0x358   : > { %2070 = vmatpush1.bf16.msra.mxu1 %v2780_v39 }
 0x359   : > { %2072 = vmatprep.subr.bf16.mxu1 %v2792_v4 }
 0x35c   : > { %2074 = vmatpush1.bf16.msra.mxu1 %v2805_v5 }
 0x35d   : > { %2076 = vmatprep.subr.bf16.mxu1 %v2851_v7 }
 0x360   : > { %2078 = vmatpush1.bf16.msra.mxu1 %v2862_v16 }
 0x361   : > { %1526 = vmatprep.subr.mxu1 %v2860_v31 }
 0x364   : > { %1528 = vmatpush1.msra.mxu1 %v2889_v56 }
 0x365   : > { %2080 = vmatprep.subr.bf16.mxu1 %v2079_v42  ;;  %1579 = vmatmul.mubr.f32.vlgmr.msra.gmra.mrb[0].mxu1 %v1213_v41  ;;  %v3097_v41 = vand.u32 4294901760, %v2843_v8 }
 0x366   : > { %2082 = vmatpush1.bf16.msra.mxu1 %v2081_v28  ;;  %1703 = vmatprep.mubr.f32.mxu1 %v3072_v33 }
 0x367   : > { %2084 = vmatprep.subr.bf16.mxu1 %v2083_v55  ;;  %v2089_v54 = vpack.c.bf16 %v3097_v41, %v1278_v26 }
 0x36a   : > { %2086 = vmatpush1.bf16.msra.mxu1 %v2085_v29 }
 0x36b   : > { %2088 = vmatprep.subr.bf16.mxu1 %v2087_v13 }
 0x36e   : > { %2090 = vmatpush1.bf16.msra.mxu1 %v2089_v54 }
 0x36f   : > { %2092 = vmatprep.subr.bf16.mxu1 %v2091_v38 }
 0x372   : > { %2094 = vmatpush1.bf16.msra.mxu1 %v2093_v18 }
 0x373   : > { %1652 = vmatprep.subr.mxu1 %v1320_v53 }
 0x376   : > { %1656 = vmatpush1.msra.mxu1 %v1326_v43 }
 0x377   : > { %2096 = vmatprep.subr.bf16.mxu1 %v2728_v3  ;;  %1705 = vmatmul.mubr.f32.vlgmr.msra.gmra.mrb[0].mxu1 %v2730_v24 }
 0x378   : > { %2098 = vmatpush1.bf16.msra.mxu1 %v2733_v49  ;;  %1793 = vmatprep.mubr.f32.mxu1 %v3072_v33 }
 0x379   : > { %2100 = vmatprep.subr.bf16.mxu1 %v2773_v15 }
 0x37c   : > { %2102 = vmatpush1.bf16.msra.mxu1 %v2780_v39 }
 0x37d   : > { %2104 = vmatprep.subr.bf16.mxu1 %v2792_v4 }
 0x380   : > { %2106 = vmatpush1.bf16.msra.mxu1 %v2805_v5 }
 0x381   : > { %2108 = vmatprep.subr.bf16.mxu1 %v2851_v7 }
 0x384   : > { %2110 = vmatpush1.bf16.msra.mxu1 %v2862_v16 }
 0x385   : > { %1744 = vmatprep.subr.mxu1 %v2860_v31 }
 0x388   : > { %1746 = vmatpush1.msra.mxu1 %v2889_v56 }
 0x389   : > { %1795 = vmatmul.mubr.f32.vlgmr.msra.gmra.mrb[0].mxu1 %v2730_v24 }
 0x45c   : > { %v1796_v3 = vpop.f32.mrb[0].mxu1 }
 0x45d   : > { %v1798_v33 = vpop.f32.mrb[1].mxu1  ;;  %v1806_v49 = vmul.f32 %v1796_v3, %v1796_v3 }
 0x45e   : > { %v1807_v15 = vmul.f32 %v1798_v33, %v1798_v33  ;;  %v1802_v0 = vadd.f32 %v1798_v33, %v1796_v3 }
 0x460   : > { %1803 = vadd.xlane.f32.xlu0 %v1802_v0  ;;  %v1808_v39 = vadd.f32 %v1807_v15, %v1806_v49 }
 0x462   : > { %1809 = vadd.xlane.f32.xlu1 %v1808_v39 }
 0x4ed   : > { %v1804_v4 = vpop.xlane.xlu0 %1803 }
 0x4ee   : > { %v1805_v12 = vmul.f32 0.00390625, %v1804_v4 }
 0x4ef   : > { %v1810_v26 = vpop.xlane.xlu1 %1809 }
 0x4f0   : > { %v1811_v6 = vmul.f32 0.00390625, %v1810_v26  ;;  %v1812_v5 = vmul.f32 %v1805_v12, %v1805_v12  ;;  %v1815_v24 = vsub.f32 %v1796_v3, %v1805_v12  ;;  %v1816_v52 = vsub.f32 %v1798_v33, %v1805_v12 }
 0x4f2   : > { %v1813_v27 = vsub.f32 %v1811_v6, %v1812_v5 }
 0x4f4   : > { %v1814_v37 = vmax.f32 %v1813_v27, 0.0 }
 0x4f6   : > { %v1817_v63 = vadd.f32 1e-05, %v1814_v37 }
 0x4f8   : > { %2161 = vrsqrt.f32 %v1817_v63 }
 0x502   : > { %v2162_v58 = vpop.eup %2161 }
 0x503   : > { %v1819_v22 = vmul.f32 %v2162_v58, %v1815_v24  ;;  %v1820_v40 = vmul.f32 %v2162_v58, %v1816_v52 }
 0x505   : > { %vm1821_vm8 = vcmp.ge.f32.partialorder %v1819_v22, 0.0  ;;  %vm1822_vm10 = vcmp.ge.f32.partialorder %v1820_v40, 0.0  ;;  %v1824_v8 = vmul.f32 %v1823_v46, %v1819_v22  ;;  %v1825_v57 = vmul.f32 %v1823_v46, %v1820_v40 }
 0x507   : > { %v1826_v7 = vsel %vm1821_vm8, %v1819_v22, %v1824_v8  ;;  %v1827_v19 = vsel %vm1822_vm10, %v1820_v40, %v1825_v57 }
 0x508   : > { %1828 = vst [vmem:[%s211_s20] sm:$0xff] %v1826_v7  ;;  %1829 = vst [vmem:[%s211_s20 + $0x8] sm:$0xff] %v1827_v19 }
 0x509 PF: > { %s15_s15 = sadd.s32 1, %s2188_s15  }
 0x50a   : > { %p12_p1 = scmp.ge.s32.totalorder %s15_s15, 4  }
 0x50c   :  { %14 = sbr.rel (!%p12_p1) target bundleno = 1 (0x1), region = 74 }
 0x513   :  { %1851 = vsyncpa [#allocation3], 1 }
 0x514   :  { %1853 = vsyncpa [#allocation3 + $0x1], 1 }

</bundles_post_ra>
